<compile_context>
chip_gen: v7x
topology: tpu7x:2x2x1
jax: 0.10.0
libtpu: 0.0.40
codegen_flags: <defaults>
</compile_context>

<pallas_src>
import jax
import jax.numpy as jnp
from jax.experimental import pallas as pl
from jax.experimental.pallas import tpu as pltpu

# ---------------- small synthetic shapes (real inception: 3x299x299 -> 2048) ----
BATCH = 2
IN_CH = 3
SPATIAL = 32
KSIZE = 3
STRIDE = 2
FEAT_CH = 128          # stand-in for inception's 2048-dim pooled feature
EMBED = 128            # embed_size
DROP_P = 0.5


def _round_up(x, m):
    return (x + m - 1) // m * m


# ---------------- fused Pallas kernel --------------------------------------------
def encoder_kernel(seed_ref,                       # scalar prefetch (SMEM)
                   p_ref, wc_ref, bc_ref, pool_ref, wf_ref, bf_ref,   # inputs
                   out_ref,                        # output
                   pooled_acc):                    # VMEM scratch (NP, FEAT_CH)
    b = pl.program_id(0)

    @pl.when(b == 0)
    def _init():
        pooled_acc[...] = jnp.zeros_like(pooled_acc)

    # stem conv as im2col matmul (bf16 operands, f32 accumulate) + bias + ReLU
    conv = jnp.dot(p_ref[...], wc_ref[...], preferred_element_type=jnp.float32)
    conv = jnp.maximum(conv + bc_ref[...], 0.0)            # (HW_PAD, FEAT_CH) f32

    # masked global-average pool on the MXU: (1, HW_PAD) @ (HW_PAD, FEAT_CH)
    pooled_acc[pl.ds(b, 1), :] = jnp.dot(
        pool_ref[...], conv, preferred_element_type=jnp.float32)

    # head: fc -> ReLU -> Dropout, once every batch has been pooled
    @pl.when(b == pl.num_programs(0) - 1)
    def _head():
        logits = jnp.dot(pooled_acc[...].astype(jnp.bfloat16), wf_ref[...],
                         preferred_element_type=jnp.float32) + bf_ref[...]
        act = jnp.maximum(logits, 0.0)                     # (NP, EMBED) f32

        # counter-based integer hash -> uniform in [0,1); keep with prob 1 - DROP_P
        rows = jax.lax.broadcasted_iota(jnp.int32, act.shape, 0)
        cols = jax.lax.broadcasted_iota(jnp.int32, act.shape, 1)
        x = rows * jnp.int32(act.shape[1]) + cols + seed_ref[0]
        x = (x ^ (x >> 16)) * jnp.int32(0x27D4EB2F)
        x = (x ^ (x >> 15)) * jnp.int32(0x165667B1)
        x = x ^ (x >> 16)
        u = (jnp.bitwise_and(x, jnp.int32((1 << 23) - 1)).astype(jnp.float32)
             * jnp.float32(1.0 / (1 << 23)))
        keep = u >= jnp.float32(DROP_P)
        dropped = jnp.where(keep, act * jnp.float32(1.0 / (1.0 - DROP_P)), 0.0)
        out_ref[...] = dropped[:out_ref.shape[0], :]


# ---------------- glue (im2col, padding, parameter setup) ------------------------
def im2col(x, k, stride):
    """x: (N, C, H, W) -> patches (N, Ho*Wo, C*k*k), channel-major within a patch."""
    n, c, h, w = x.shape
    ho = (h - k) // stride + 1
    wo = (w - k) // stride + 1
    cols = []
    for di in range(k):
        for dj in range(k):
            cols.append(x[:, :, di:di + stride * ho:stride, dj:dj + stride * wo:stride])
    p = jnp.stack(cols, axis=2)                       # (N, C, k*k, Ho, Wo)
    p = p.transpose(0, 3, 4, 1, 2).reshape(n, ho * wo, c * k * k)
    return p, ho, wo


def encoder_cnn_forward(images, params, seed):
    """images: (N, C, H, W) float32 -> (N, EMBED) float32 (train-mode dropout)."""
    w_conv, b_conv, w_fc, b_fc = params
    n = images.shape[0]

    # TODO(synk): at real Inception scale (299x299) the im2col patch tensor should be
    # gathered inside the kernel (manual DMA) instead of materialized in HBM.
    patches, ho, wo = im2col(images, KSIZE, STRIDE)   # (N, HW, Kdim)
    hw = ho * wo
    k_dim = patches.shape[-1]
    hw_pad = _round_up(hw, 128)           # sublane/M-dense rows for the conv matmul
    k_pad = _round_up(k_dim, 128)         # lane-dense contraction dim (unmasked loads)
    np_rows = _round_up(max(n, 8), 8)     # sublane-padded pooled-accumulator rows

    patches = jnp.pad(patches, ((0, 0), (0, hw_pad - hw), (0, k_pad - k_dim)))
    patches = patches.astype(jnp.bfloat16)

    w_mat = w_conv.reshape(FEAT_CH, k_dim).T                           # (Kdim, FEAT_CH)
    w_mat = jnp.pad(w_mat, ((0, k_pad - k_dim), (0, 0))).astype(jnp.bfloat16)
    b_row = b_conv.reshape(1, FEAT_CH).astype(jnp.float32)

    # masked average-pool weights: 1/HW on valid rows, 0 on padded rows
    pool_row = ((jnp.arange(hw_pad) < hw).astype(jnp.float32) / hw).reshape(1, hw_pad)

    w_fc_t = w_fc.T.astype(jnp.bfloat16)                               # (FEAT_CH, EMBED)
    b_fc_row = b_fc.reshape(1, EMBED).astype(jnp.float32)
    seed_arr = jnp.asarray(seed, dtype=jnp.int32).reshape(1)

    out = pl.pallas_call(
        encoder_kernel,
        out_shape=jax.ShapeDtypeStruct((n, EMBED), jnp.float32),
        grid_spec=pltpu.PrefetchScalarGridSpec(
            num_scalar_prefetch=1,
            grid=(n,),
            in_specs=[
                pl.BlockSpec((None, hw_pad, k_pad), lambda b, s: (b, 0, 0)),
                pl.BlockSpec((k_pad, FEAT_CH), lambda b, s: (0, 0)),
                pl.BlockSpec((1, FEAT_CH), lambda b, s: (0, 0)),
                pl.BlockSpec((1, hw_pad), lambda b, s: (0, 0)),
                pl.BlockSpec((FEAT_CH, EMBED), lambda b, s: (0, 0)),
                pl.BlockSpec((1, EMBED), lambda b, s: (0, 0)),
            ],
            out_specs=pl.BlockSpec((n, EMBED), lambda b, s: (0, 0)),
            scratch_shapes=[pltpu.VMEM((np_rows, FEAT_CH), jnp.float32)],
        ),
        compiler_params=pltpu.CompilerParams(dimension_semantics=("arbitrary",)),
    )(seed_arr, patches, w_mat, b_row, pool_row, w_fc_t, b_fc_row)
    return out                                                        # (N, EMBED)


def init_params(key):
    k1, k2, k3, k4 = jax.random.split(key, 4)
    # stem conv (BasicConv2d with BN folded into weight/bias)
    w_conv = 0.05 * jax.random.normal(k1, (FEAT_CH, IN_CH, KSIZE, KSIZE), jnp.float32)
    b_conv = 0.01 * jax.random.normal(k2, (FEAT_CH,), jnp.float32)
    # replaced fc: nn.Linear(in_features=FEAT_CH, out_features=EMBED)
    w_fc = 0.05 * jax.random.normal(k3, (EMBED, FEAT_CH), jnp.float32)
    b_fc = 0.01 * jax.random.normal(k4, (EMBED,), jnp.float32)
    return w_conv, b_conv, w_fc, b_fc


if __name__ == "__main__":
    key = jax.random.PRNGKey(0)
    pkey, xkey = jax.random.split(key)
    params = init_params(pkey)
    images = jax.random.normal(xkey, (BATCH, IN_CH, SPATIAL, SPATIAL), jnp.float32)

    fwd = jax.jit(encoder_cnn_forward)
    out = fwd(images, params, jnp.int32(42))
    jax.block_until_ready(out)
    assert out.shape == (BATCH, EMBED) and out.dtype == jnp.float32
    assert bool(jnp.all(jnp.isfinite(out)))
    print("KERNEL_OK")
</pallas_src>

<mosaic_0001>
module attributes {stable_mosaic.version = 11 : i64} {
  func.func @encoder_kernel(%arg0: i32, %arg1: memref<1xi32, #tpu.memory_space<smem>>, %arg2: memref<1x256x128xbf16, #tpu.memory_space<vmem>>, %arg3: memref<128x128xbf16, #tpu.memory_space<vmem>>, %arg4: memref<1x128xf32, #tpu.memory_space<vmem>>, %arg5: memref<1x256xf32, #tpu.memory_space<vmem>>, %arg6: memref<128x128xbf16, #tpu.memory_space<vmem>>, %arg7: memref<1x128xf32, #tpu.memory_space<vmem>>, %arg8: memref<2x128xf32, #tpu.memory_space<vmem>>, %arg9: memref<8x128xf32, #tpu.memory_space<vmem>>) attributes {dimension_semantics = [#tpu.dimension_semantics<arbitrary>], iteration_bounds = array<i64: 2>, scalar_prefetch = 1 : i64, scratch_operands = 1 : i64, tpu.core_type = #tpu.core_type<tc>, window_params = [{transform_indices = @transform_0, window_bounds = array<i64: 1, 256, 128>}, {pipeline_mode = #tpu.pipeline_mode<synchronous>, transform_indices = @transform_1, window_bounds = array<i64: 128, 128>}, {pipeline_mode = #tpu.pipeline_mode<synchronous>, transform_indices = @transform_2, window_bounds = array<i64: 1, 128>}, {pipeline_mode = #tpu.pipeline_mode<synchronous>, transform_indices = @transform_3, window_bounds = array<i64: 1, 256>}, {pipeline_mode = #tpu.pipeline_mode<synchronous>, transform_indices = @transform_4, window_bounds = array<i64: 128, 128>}, {pipeline_mode = #tpu.pipeline_mode<synchronous>, transform_indices = @transform_5, window_bounds = array<i64: 1, 128>}, {pipeline_mode = #tpu.pipeline_mode<synchronous>, transform_indices = @transform_6, window_bounds = array<i64: 2, 128>}]} {
    %c0_i32 = arith.constant 0 : i32
    %0 = arith.cmpi eq, %arg0, %c0_i32 : i32
    %1 = arith.extui %0 : i1 to i32
    %c0_i32_0 = arith.constant 0 : i32
    %2 = arith.cmpi ne, %1, %c0_i32_0 : i32
    scf.if %2 {
      %cst_13 = arith.constant 0.000000e+00 : f32
      %19 = vector.broadcast %cst_13 : f32 to vector<8x128xf32>
      %c0_14 = arith.constant 0 : index
      %c0_15 = arith.constant 0 : index
      %20 = vector.load %arg9[%c0_14, %c0_15] : memref<8x128xf32, #tpu.memory_space<vmem>>, vector<8x128xf32>
      tpu.vector_store %arg9[%c0_14, %c0_15], %19 {strides = array<i32>} : memref<8x128xf32, #tpu.memory_space<vmem>>, vector<8x128xf32>,
    } else {
    }
    %c0 = arith.constant 0 : index
    %c0_1 = arith.constant 0 : index
    %c0_2 = arith.constant 0 : index
    %3 = vector.load %arg2[%c0, %c0_1, %c0_2] : memref<1x256x128xbf16, #tpu.memory_space<vmem>>, vector<1x256x128xbf16>
    %4 = vector.shape_cast %3 : vector<1x256x128xbf16> to vector<256x128xbf16>
    %c0_3 = arith.constant 0 : index
    %c0_4 = arith.constant 0 : index
    %5 = vector.load %arg3[%c0_3, %c0_4] : memref<128x128xbf16, #tpu.memory_space<vmem>>, vector<128x128xbf16>
    %cst = arith.constant dense<0.000000e+00> : vector<256x128xf32>
    %6 = tpu.matmul %4, %5, %cst {dimension_numbers = #tpu.dot_dimension_numbers<[1], [0], [0], [1], [0, 0, 1, 1], [], []>} : vector<256x128xbf16>, vector<128x128xbf16>, vector<256x128xf32> -> vector<256x128xf32>
    %c0_5 = arith.constant 0 : index
    %c0_6 = arith.constant 0 : index
    %7 = vector.load %arg4[%c0_5, %c0_6] : memref<1x128xf32, #tpu.memory_space<vmem>>, vector<1x128xf32>
    %8 = vector.broadcast %7 : vector<1x128xf32> to vector<256x128xf32>
    %9 = arith.addf %6, %8 : vector<256x128xf32>
    %cst_7 = arith.constant 0.000000e+00 : f32
    %10 = vector.broadcast %cst_7 : f32 to vector<256x128xf32>
    %11 = arith.maximumf %9, %10 : vector<256x128xf32>
    %c0_8 = arith.constant 0 : index
    %c0_9 = arith.constant 0 : index
    %12 = vector.load %arg5[%c0_8, %c0_9] : memref<1x256xf32, #tpu.memory_space<vmem>>, vector<1x256xf32>
    %cst_10 = arith.constant dense<0.000000e+00> : vector<1x128xf32>
    %13 = tpu.matmul %12, %11, %cst_10 {dimension_numbers = #tpu.dot_dimension_numbers<[1], [0], [0], [1], [0, 0, 1, 1], [], []>} : vector<1x256xf32>, vector<256x128xf32>, vector<1x128xf32> -> vector<1x128xf32>
    %14 = arith.index_cast %arg0 : i32 to index
    %c0_11 = arith.constant 0 : index
    %15 = vector.load %arg9[%14, %c0_11] : memref<8x128xf32, #tpu.memory_space<vmem>>, vector<1x128xf32>
    tpu.vector_store %arg9[%14, %c0_11], %13 {strides = array<i32>} : memref<8x128xf32, #tpu.memory_space<vmem>>, vector<1x128xf32>,
    %c1_i32 = arith.constant 1 : i32
    %16 = arith.cmpi eq, %arg0, %c1_i32 : i32
    %17 = arith.extui %16 : i1 to i32
    %c0_i32_12 = arith.constant 0 : i32
    %18 = arith.cmpi ne, %17, %c0_i32_12 : i32
    scf.if %18 {
      %c0_13 = arith.constant 0 : index
      %c0_14 = arith.constant 0 : index
      %19 = vector.load %arg9[%c0_13, %c0_14] : memref<8x128xf32, #tpu.memory_space<vmem>>, vector<8x128xf32>
      %20 = arith.truncf %19 : vector<8x128xf32> to vector<8x128xbf16>
      %c0_15 = arith.constant 0 : index
      %c0_16 = arith.constant 0 : index
      %21 = vector.load %arg6[%c0_15, %c0_16] : memref<128x128xbf16, #tpu.memory_space<vmem>>, vector<128x128xbf16>
      %cst_17 = arith.constant dense<0.000000e+00> : vector<8x128xf32>
      %22 = tpu.matmul %20, %21, %cst_17 {dimension_numbers = #tpu.dot_dimension_numbers<[1], [0], [0], [1], [0, 0, 1, 1], [], []>} : vector<8x128xbf16>, vector<128x128xbf16>, vector<8x128xf32> -> vector<8x128xf32>
      %c0_18 = arith.constant 0 : index
      %c0_19 = arith.constant 0 : index
      %23 = vector.load %arg7[%c0_18, %c0_19] : memref<1x128xf32, #tpu.memory_space<vmem>>, vector<1x128xf32>
      %24 = vector.broadcast %23 : vector<1x128xf32> to vector<8x128xf32>
      %25 = arith.addf %22, %24 : vector<8x128xf32>
      %cst_20 = arith.constant 0.000000e+00 : f32
      %26 = vector.broadcast %cst_20 : f32 to vector<8x128xf32>
      %27 = arith.maximumf %25, %26 : vector<8x128xf32>
      %28 = tpu.iota {dimensions = array<i32: 0>} : vector<8x128xi32>
      %29 = tpu.iota {dimensions = array<i32: 1>} : vector<8x128xi32>
      %c128_i32 = arith.constant 128 : i32
      %30 = vector.broadcast %c128_i32 : i32 to vector<8x128xi32>
      %31 = arith.muli %28, %30 : vector<8x128xi32>
      %32 = arith.addi %31, %29 : vector<8x128xi32>
      %c0_21 = arith.constant 0 : index
      %33 = memref.load %arg1[%c0_21] : memref<1xi32, #tpu.memory_space<smem>>
      %34 = vector.broadcast %33 : i32 to vector<8x128xi32>
      %35 = arith.addi %32, %34 : vector<8x128xi32>
      %c16_i32 = arith.constant 16 : i32
      %36 = vector.broadcast %c16_i32 : i32 to vector<8x128xi32>
      %37 = arith.shrsi %35, %36 : vector<8x128xi32>
      %38 = arith.xori %35, %37 : vector<8x128xi32>
      %c668265263_i32 = arith.constant 668265263 : i32
      %39 = vector.broadcast %c668265263_i32 : i32 to vector<8x128xi32>
      %40 = arith.muli %38, %39 : vector<8x128xi32>
      %c15_i32 = arith.constant 15 : i32
      %41 = vector.broadcast %c15_i32 : i32 to vector<8x128xi32>
      %42 = arith.shrsi %40, %41 : vector<8x128xi32>
      %43 = arith.xori %40, %42 : vector<8x128xi32>
      %c374761393_i32 = arith.constant 374761393 : i32
      %44 = vector.broadcast %c374761393_i32 : i32 to vector<8x128xi32>
      %45 = arith.muli %43, %44 : vector<8x128xi32>
      %c16_i32_22 = arith.constant 16 : i32
      %46 = vector.broadcast %c16_i32_22 : i32 to vector<8x128xi32>
      %47 = arith.shrsi %45, %46 : vector<8x128xi32>
      %48 = arith.xori %45, %47 : vector<8x128xi32>
      %c8388607_i32 = arith.constant 8388607 : i32
      %49 = vector.broadcast %c8388607_i32 : i32 to vector<8x128xi32>
      %50 = arith.andi %48, %49 : vector<8x128xi32>
      %51 = arith.sitofp %50 : vector<8x128xi32> to vector<8x128xf32>
      %cst_23 = arith.constant 1.1920929E-7 : f32
      %52 = vector.broadcast %cst_23 : f32 to vector<8x128xf32>
      %53 = arith.mulf %51, %52 : vector<8x128xf32>
      %cst_24 = arith.constant 5.000000e-01 : f32
      %54 = vector.broadcast %cst_24 : f32 to vector<8x128xf32>
      %55 = arith.cmpf oge, %53, %54 : vector<8x128xf32>
      %cst_25 = arith.constant 2.000000e+00 : f32
      %56 = vector.broadcast %cst_25 : f32 to vector<8x128xf32>
      %57 = arith.mulf %27, %56 : vector<8x128xf32>
      %cst_26 = arith.constant 0.000000e+00 : f32
      %58 = vector.broadcast %cst_26 : f32 to vector<8x128xf32>
      %59 = arith.select %55, %57, %58 : vector<8x128xi1>, vector<8x128xf32>
      %60 = vector.extract_strided_slice %59 {offsets = [0, 0], sizes = [2, 128], strides = [1, 1]} : vector<8x128xf32> to vector<2x128xf32>
      %c0_27 = arith.constant 0 : index
      %c0_28 = arith.constant 0 : index
      %61 = vector.load %arg8[%c0_27, %c0_28] : memref<2x128xf32, #tpu.memory_space<vmem>>, vector<2x128xf32>
      tpu.vector_store %arg8[%c0_27, %c0_28], %60 {strides = array<i32>} : memref<2x128xf32, #tpu.memory_space<vmem>>, vector<2x128xf32>,
    } else {
    }
    return
  }
  func.func @transform_0(%arg0: i32, %arg1: memref<1xi32, #tpu.memory_space<smem>>) -> (i32, i32, i32) {
    %c0_i32 = arith.constant 0 : i32
    %c0_i32_0 = arith.constant 0 : i32
    %c0_i32_1 = arith.constant 0 : i32
    return %arg0, %c0_i32, %c0_i32_0 : i32, i32, i32
  }
  func.func @transform_1(%arg0: i32, %arg1: memref<1xi32, #tpu.memory_space<smem>>) -> (i32, i32) {
    %c0_i32 = arith.constant 0 : i32
    %c0_i32_0 = arith.constant 0 : i32
    %c0_i32_1 = arith.constant 0 : i32
    return %c0_i32, %c0_i32_0 : i32, i32
  }
  func.func @transform_2(%arg0: i32, %arg1: memref<1xi32, #tpu.memory_space<smem>>) -> (i32, i32) {
    %c0_i32 = arith.constant 0 : i32
    %c0_i32_0 = arith.constant 0 : i32
    %c0_i32_1 = arith.constant 0 : i32
    return %c0_i32, %c0_i32_0 : i32, i32
  }
  func.func @transform_3(%arg0: i32, %arg1: memref<1xi32, #tpu.memory_space<smem>>) -> (i32, i32) {
    %c0_i32 = arith.constant 0 : i32
    %c0_i32_0 = arith.constant 0 : i32
    %c0_i32_1 = arith.constant 0 : i32
    return %c0_i32, %c0_i32_0 : i32, i32
  }
  func.func @transform_4(%arg0: i32, %arg1: memref<1xi32, #tpu.memory_space<smem>>) -> (i32, i32) {
    %c0_i32 = arith.constant 0 : i32
    %c0_i32_0 = arith.constant 0 : i32
    %c0_i32_1 = arith.constant 0 : i32
    return %c0_i32, %c0_i32_0 : i32, i32
  }
  func.func @transform_5(%arg0: i32, %arg1: memref<1xi32, #tpu.memory_space<smem>>) -> (i32, i32) {
    %c0_i32 = arith.constant 0 : i32
    %c0_i32_0 = arith.constant 0 : i32
    %c0_i32_1 = arith.constant 0 : i32
    return %c0_i32, %c0_i32_0 : i32, i32
  }
  func.func @transform_6(%arg0: i32, %arg1: memref<1xi32, #tpu.memory_space<smem>>) -> (i32, i32) {
    %c0_i32 = arith.constant 0 : i32
    %c0_i32_0 = arith.constant 0 : i32
    %c0_i32_1 = arith.constant 0 : i32
    return %c0_i32, %c0_i32_0 : i32, i32
  }
}

</mosaic_0001>

<bundles_post_ra>
// kernel: encoder_cnn_forward.1
= control target key start
LH: loop header
LB: loop body
LE: loop exit
PB: predicated region body
PF: predicated region fallthrough
CT: control target
= control target key end

     0   :  { %s1444_s0 = inlined_call_operand.<no memory space> [shape: s32[1], index: 0, kind: input, shape index: {}]   ;;  %s1445_s1 = inlined_call_operand.vmem [shape: bf16[2,256,128], index: 1, kind: input, shape index: {}]   ;;  %s1446_s2 = inlined_call_operand.vmem [shape: bf16[128,128], index: 2, kind: input, shape index: {}]   ;;  %s1447_s3 = inlined_call_operand.vmem [shape: f32[1,128], index: 3, kind: input, shape index: {}]   ;;  %s1448_s4 = inlined_call_operand.vmem [shape: f32[1,256], index: 4, kind: input, shape index: {}]   ;;  %s1449_s5 = inlined_call_operand.vmem [shape: bf16[128,128], index: 5, kind: input, shape index: {}]   ;;  %s1450_s6 = inlined_call_operand.vmem [shape: f32[1,128], index: 6, kind: input, shape index: {}]   ;;  %s1451_s7 = inlined_call_operand.hbm [shape: f32[2,128], index: 7, kind: output, shape index: {}]  }
   0x1   :  { %12 = sst [smem:[#allocation4]] %s1444_s0 }
   0x2   :  { %13 = vsyncpa [#allocation6], 0  ;;  %s1281_s26 = smov 0  }
   0x3 LB: > { %s1287_s27 = sadd.s32 4294967295, %s1232_s26   ;;  %p914_p0 = scmp.ge.s32.totalorder %s1232_s26, 1  ;;  %s1232_s26 = sphi %s1281_s26, %s19_s26  }
   0x4   : > { %p210_p1 = scmp.lt.s32.totalorder %s1232_s26, 3 }
   0x6   : > { %p211_p2 = pnand %p914_p0, %p210_p1 }
   0x7   : > { %p235_p3 = scmp.lt.s32.totalorder (!%p211_p2), %s1287_s27, 1  ;;  %p917_p4 = scmp.ne.s32.totalorder (!%p211_p2), %s1287_s27, 0 }
   0x8   : > { %214 = sbr.rel (%p211_p2) target bundleno = 779 (0x30b), region = 44 }
   0xf   : > { %s236_s0 = scalar_select %p235_p3, %s1287_s27, 1 }
  0x10   : > { %244 = sbr.rel (%p917_p4) target bundleno = 23 (0x17), region = 48  ;;  %v1234_v0 = vmov (!%p917_p4), 0.0  }
  0x11   : > { %s958_s28 = sshll.u32 %s236_s0, 7  ;;  %245 = vst [vmem:[#allocation2] sm:$0xff] (!%p917_p4), %v1234_v0 }
  0x12   : > { %s1296_s8 = scalar_lea.vmem %s1445_s1, %s958_s28 }
  0x17 PF: > { %v1164_v1 = vld [vmem:[%s1446_s2] sm:$0xff]   ;;  %v1165_v2 = vld [vmem:[%s1446_s2 + $0x8] sm:$0xff]   ;;  %v1166_v3 = vld [vmem:[%s1446_s2 + $0x10] sm:$0xff]   ;;  %v640_v25 = vlaneseq  ;;  %s959_s30 = scalar_lea.vmem [#allocation2], %s1232_s26  ;;  %p944_p5 = scmp.ne.s32.totalorder %s1287_s27, 1 }
  0x18   : > { %1030 = vmatprep.subr.bf16.mxu0 %v1164_v1  ;;  %1130 = vmatprep.subr.bf16.mxu1 %v1164_v1  ;;  %v1167_v4 = vld [vmem:[%s1446_s2 + $0x18] sm:$0xff]   ;;  %v1172_v5 = vld [vmem:[%s1296_s8] sm:$0xff]   ;;  %v1169_v8 = vld [vmem:[%s1446_s2 + $0x28] sm:$0xff]   ;;  %vm1236_vm0 = vmmov (!%p944_p5), 0   ;;  %s846_s24 = sld [smem:[#allocation4]] (!%p944_p5) }
  0x19   : > { %1031 = vmatpush3.bf16.msra.mxu0 %v1164_v1  ;;  %1138 = vmatpush3.bf16.msra.mxu1 %v1164_v1  ;;  %v1173_v6 = vld [vmem:[%s1296_s8 + $0x40] sm:$0xff]   ;;  %v1170_v9 = vld [vmem:[%s1446_s2 + $0x30] sm:$0xff]   ;;  %v1171_v10 = vld [vmem:[%s1446_s2 + $0x38] sm:$0xff]   ;;  %v1340_v26 = vshrl.u32 %v640_v25, 7 }
  0x1a   : > { %1032 = vmatprep.subr.bf16.mxu0 %v1165_v2  ;;  %1131 = vmatprep.subr.bf16.mxu1 %v1165_v2  ;;  %v1168_v7 = vld [vmem:[%s1446_s2 + $0x20] sm:$0xff]   ;;  %v1174_v11 = vld [vmem:[%s1296_s8 + $0x8] sm:$0xff]   ;;  %v1176_v13 = vld [vmem:[%s1296_s8 + $0x10] sm:$0xff]  }
  0x1b   : > { %1046 = vmatprep.mubr.bf16.mxu0 %v1172_v5  ;;  %1062 = vmatprep.mubr.bf16.mxu1 %v1173_v6  ;;  %v1175_v12 = vld [vmem:[%s1296_s8 + $0x48] sm:$0xff]   ;;  %v1177_v14 = vld [vmem:[%s1296_s8 + $0x50] sm:$0xff]   ;;  %v1178_v15 = vld [vmem:[%s1296_s8 + $0x18] sm:$0xff]   ;;  %v646_v27 = vsub.s32 1, %v1340_v26  ;;  %v642_v29 = vsub.s32 0, %v1340_v26 }
  0x1c   : > { %v1179_v16 = vld [vmem:[%s1296_s8 + $0x58] sm:$0xff]   ;;  %v1180_v17 = vld [vmem:[%s1296_s8 + $0x20] sm:$0xff]   ;;  %v1182_v19 = vld [vmem:[%s1296_s8 + $0x28] sm:$0xff]  }
  0x1d   : > { %1033 = vmatpush3.bf16.msra.mxu0 %v1165_v2  ;;  %1139 = vmatpush3.bf16.msra.mxu1 %v1165_v2  ;;  %v1181_v18 = vld [vmem:[%s1296_s8 + $0x60] sm:$0xff]   ;;  %v1183_v20 = vld [vmem:[%s1296_s8 + $0x68] sm:$0xff]   ;;  %v1184_v21 = vld [vmem:[%s1296_s8 + $0x30] sm:$0xff]  }
  0x1e   : > { %1034 = vmatprep.subr.bf16.mxu0 %v1166_v3  ;;  %1132 = vmatprep.subr.bf16.mxu1 %v1166_v3  ;;  %v1185_v22 = vld [vmem:[%s1296_s8 + $0x70] sm:$0xff]   ;;  %v1186_v23 = vld [vmem:[%s1296_s8 + $0x38] sm:$0xff]   ;;  %v638_v28 = vld [vmem:[%s1448_s4] sm:$0x3] }
  0x1f   : > { %v1187_v24 = vld [vmem:[%s1296_s8 + $0x78] sm:$0xff]   ;;  %v647_v30 = vrot.slane %v638_v28, %v646_v27  ;;  %v1347_v31 = vrot.slane %v638_v28, %v642_v29  ;;  %v1352_v32 = vld [vmem:[%s1447_s3] ss:$0 sm:$0xff] }
  0x21   : > { %1035 = vmatpush3.bf16.msra.mxu0 %v1166_v3  ;;  %1140 = vmatpush3.bf16.msra.mxu1 %v1166_v3 }
  0x22   : > { %1036 = vmatprep.subr.bf16.mxu0 %v1167_v4  ;;  %1133 = vmatprep.subr.bf16.mxu1 %v1167_v4 }
  0x25   : > { %1037 = vmatpush3.bf16.msra.mxu0 %v1167_v4  ;;  %1141 = vmatpush3.bf16.msra.mxu1 %v1167_v4 }
  0x26   : > { %1038 = vmatprep.subr.bf16.mxu0 %v1168_v7  ;;  %1134 = vmatprep.subr.bf16.mxu1 %v1168_v7 }
  0x29   : > { %1039 = vmatpush3.bf16.msra.mxu0 %v1168_v7  ;;  %1142 = vmatpush3.bf16.msra.mxu1 %v1168_v7 }
  0x2a   : > { %1040 = vmatprep.subr.bf16.mxu0 %v1169_v8  ;;  %1135 = vmatprep.subr.bf16.mxu1 %v1169_v8 }
  0x2d   : > { %1041 = vmatpush3.bf16.msra.mxu0 %v1169_v8  ;;  %1143 = vmatpush3.bf16.msra.mxu1 %v1169_v8 }
  0x2e   : > { %1042 = vmatprep.subr.bf16.mxu0 %v1170_v9  ;;  %1136 = vmatprep.subr.bf16.mxu1 %v1170_v9 }
  0x31   : > { %1043 = vmatpush3.bf16.msra.mxu0 %v1170_v9  ;;  %1144 = vmatpush3.bf16.msra.mxu1 %v1170_v9 }
  0x32   : > { %1044 = vmatprep.subr.bf16.mxu0 %v1171_v10  ;;  %1137 = vmatprep.subr.bf16.mxu1 %v1171_v10 }
  0x35   : > { %1045 = vmatpush3.bf16.msra.mxu0 %v1171_v10  ;;  %1145 = vmatpush3.bf16.msra.mxu1 %v1171_v10 }
  0x38   : > { %1047 = vmatmul.mubr.bf16.vlgmr.msra.gmra.mrb[0].mxu0 %v1174_v11  ;;  %1063 = vmatmul.mubr.bf16.vlgmr.msra.gmra.mrb[0].mxu1 %v1175_v12 }
  0x39   : > { %1050 = vmatprep.mubr.bf16.mxu0 %v1176_v13  ;;  %1066 = vmatprep.mubr.bf16.mxu1 %v1177_v14 }
  0x40   : > { %1051 = vmatmul.mubr.bf16.gmra.mrb[4].mxu0 %v1178_v15  ;;  %1067 = vmatmul.mubr.bf16.gmra.mrb[4].mxu1 %v1179_v16 }
  0x41   : > { %1054 = vmatprep.mubr.bf16.mxu0 %v1180_v17  ;;  %1070 = vmatprep.mubr.bf16.mxu1 %v1181_v18 }
  0x48   : > { %1055 = vmatmul.mubr.bf16.gmra.mrb[8].mxu0 %v1182_v19  ;;  %1071 = vmatmul.mubr.bf16.gmra.mrb[8].mxu1 %v1183_v20 }
  0x49   : > { %1058 = vmatprep.mubr.bf16.mxu0 %v1184_v21  ;;  %1074 = vmatprep.mubr.bf16.mxu1 %v1185_v22 }
  0x50   : > { %1059 = vmatmul.mubr.bf16.gmra.mrb[12].mxu0 %v1186_v23  ;;  %1075 = vmatmul.mubr.bf16.gmra.mrb[12].mxu1 %v1187_v24 }
  0x51   : > { %714 = vmatprep.mubr.f32.mxu1 %v647_v30 }
 0x10b   : > { %v1048_v33 = vpop.f32.mrb[0].mxu0  ;;  %v1064_v34 = vpop.f32.mrb[0].mxu1 }
 0x10c   : > { %v488_v35 = vadd.f32 %v1048_v33, %v1352_v32  ;;  %v552_v36 = vadd.f32 %v1064_v34, %v1352_v32  ;;  %v479_v37 = vpop.f32.mrb[1].mxu0  ;;  %v543_v38 = vpop.f32.mrb[1].mxu1 }
 0x10d   : > { %v480_v39 = vadd.f32 %v1352_v32, %v479_v37  ;;  %v544_v40 = vadd.f32 %v1352_v32, %v543_v38  ;;  %v1049_v41 = vpop.f32.mrb[2].mxu0  ;;  %v1065_v42 = vpop.f32.mrb[2].mxu1 }
 0x10e   : > { %v608_v43 = vmax.f32 %v488_v35, 0.0  ;;  %v491_v44 = vadd.f32 %v1049_v41, %v1352_v32  ;;  %v555_v45 = vadd.f32 %v1065_v42, %v1352_v32  ;;  %v482_v46 = vpop.f32.mrb[3].mxu0  ;;  %v546_v47 = vpop.f32.mrb[3].mxu1  ;;  %v624_v50 = vmax.f32 %v552_v36, 0.0 }
 0x10f   : > { %v483_v48 = vadd.f32 %v1352_v32, %v482_v46  ;;  %v547_v49 = vadd.f32 %v1352_v32, %v546_v47  ;;  %v606_v53 = vmax.f32 %v480_v39, 0.0  ;;  %v622_v54 = vmax.f32 %v544_v40, 0.0 }
 0x110   : > { %v609_v51 = vmax.f32 %v491_v44, 0.0  ;;  %v625_v52 = vmax.f32 %v555_v45, 0.0 }
 0x111   : > { %v607_v55 = vmax.f32 %v483_v48, 0.0  ;;  %v623_v56 = vmax.f32 %v547_v49, 0.0 }
 0x112   : > { %v1104_v57 = vpack.c.bf16 %v609_v51, %v608_v43  ;;  %v1102_v58 = vpack.c.bf16 %v625_v52, %v624_v50 }
 0x113   : > { %v1100_v59 = vpack.c.bf16 %v607_v55, %v606_v53  ;;  %v1098_v60 = vpack.c.bf16 %v623_v56, %v622_v54  ;;  %v1052_v61 = vpop.f32.mrb[4].mxu0  ;;  %v1068_v62 = vpop.f32.mrb[4].mxu1 }
 0x114   : > { %v504_v63 = vadd.f32 %v1052_v61, %v1352_v32  ;;  %v568_v0 = vadd.f32 %v1068_v62, %v1352_v32  ;;  %v495_v1 = vpop.f32.mrb[5].mxu0  ;;  %v559_v2 = vpop.f32.mrb[5].mxu1 }
 0x115   : > { %v496_v3 = vadd.f32 %v1352_v32, %v495_v1  ;;  %v560_v4 = vadd.f32 %v1352_v32, %v559_v2  ;;  %v1053_v5 = vpop.f32.mrb[6].mxu0  ;;  %v1069_v6 = vpop.f32.mrb[6].mxu1  ;;  %1099 = vmatprep.subr.bf16.mxu1 %v1098_v60 }
 0x116   : > { %v612_v7 = vmax.f32 %v504_v63, 0.0  ;;  %v507_v8 = vadd.f32 %v1053_v5, %v1352_v32  ;;  %v571_v9 = vadd.f32 %v1069_v6, %v1352_v32  ;;  %v498_v10 = vpop.f32.mrb[7].mxu0  ;;  %v562_v11 = vpop.f32.mrb[7].mxu1  ;;  %1101 = vmatpush3.bf16.msra.mxu1 %v1100_v59  ;;  %v628_v14 = vmax.f32 %v568_v0, 0.0 }
 0x117   : > { %v499_v12 = vadd.f32 %v1352_v32, %v498_v10  ;;  %v563_v13 = vadd.f32 %v1352_v32, %v562_v11  ;;  %1103 = vmatprep.subr.bf16.mxu1 %v1102_v58  ;;  %v610_v17 = vmax.f32 %v496_v3, 0.0  ;;  %v626_v18 = vmax.f32 %v560_v4, 0.0 }
 0x118   : > { %v613_v15 = vmax.f32 %v507_v8, 0.0  ;;  %v629_v16 = vmax.f32 %v571_v9, 0.0 }
 0x119   : > { %v611_v19 = vmax.f32 %v499_v12, 0.0  ;;  %v627_v20 = vmax.f32 %v563_v13, 0.0 }
 0x11a   : > { %v1112_v21 = vpack.c.bf16 %v613_v15, %v612_v7  ;;  %v1110_v22 = vpack.c.bf16 %v629_v16, %v628_v14  ;;  %1105 = vmatpush3.bf16.msra.mxu1 %v1104_v57 }
 0x11b   : > { %v1108_v23 = vpack.c.bf16 %v611_v19, %v610_v17  ;;  %v1106_v24 = vpack.c.bf16 %v627_v20, %v626_v18  ;;  %v1056_v27 = vpop.f32.mrb[8].mxu0  ;;  %v1072_v28 = vpop.f32.mrb[8].mxu1 }
 0x11c   : > { %v520_v29 = vadd.f32 %v1056_v27, %v1352_v32  ;;  %v584_v30 = vadd.f32 %v1072_v28, %v1352_v32  ;;  %v511_v33 = vpop.f32.mrb[9].mxu0  ;;  %v575_v34 = vpop.f32.mrb[9].mxu1  ;;  %v1189_v27 = vld [vmem:[%s1449_s5 + $0x8] sm:$0xff] (!%p944_p5)   ;;  %v1191_v28 = vld [vmem:[%s1449_s5 + $0x18] sm:$0xff] (!%p944_p5)  }
 0x11d   : > { %v512_v35 = vadd.f32 %v1352_v32, %v511_v33  ;;  %v576_v36 = vadd.f32 %v1352_v32, %v575_v34  ;;  %v1057_v37 = vpop.f32.mrb[10].mxu0  ;;  %v1073_v38 = vpop.f32.mrb[10].mxu1  ;;  %1107 = vmatprep.subr.bf16.mxu1 %v1106_v24  ;;  %v1235_v24 = vmov (!%p944_p5), 0.0   ;;  %v1194_v33 = vld [vmem:[%s1449_s5 + $0x30] sm:$0xff] (!%p944_p5)   ;;  %v1195_v34 = vld [vmem:[%s1449_s5 + $0x38] sm:$0xff] (!%p944_p5)  }
 0x11e   : > { %v616_v39 = vmax.f32 %v520_v29, 0.0  ;;  %v523_v40 = vadd.f32 %v1057_v37, %v1352_v32  ;;  %v587_v41 = vadd.f32 %v1073_v38, %v1352_v32  ;;  %v514_v42 = vpop.f32.mrb[11].mxu0  ;;  %v578_v43 = vpop.f32.mrb[11].mxu1  ;;  %1109 = vmatpush3.bf16.msra.mxu1 %v1108_v23  ;;  %v632_v46 = vmax.f32 %v584_v30, 0.0  ;;  %v1188_v23 = vld [vmem:[%s1449_s5] sm:$0xff] (!%p944_p5)   ;;  %1078 = vmatprep.subr.bf16.mxu0 (!%p944_p5), %v1235_v24  ;;  %v1193_v30 = vld [vmem:[%s1449_s5 + $0x28] sm:$0xff] (!%p944_p5)  }
 0x11f   : > { %v515_v44 = vadd.f32 %v1352_v32, %v514_v42  ;;  %v579_v45 = vadd.f32 %v1352_v32, %v578_v43  ;;  %1111 = vmatprep.subr.bf16.mxu1 %v1110_v22  ;;  %v614_v49 = vmax.f32 %v512_v35, 0.0  ;;  %v630_v50 = vmax.f32 %v576_v36, 0.0  ;;  %1079 = vmatpush3.bf16.msra.mxu0 (!%p944_p5), %v1188_v23  ;;  %v1192_v29 = vld [vmem:[%s1449_s5 + $0x20] sm:$0xff] (!%p944_p5)  }
 0x120   : > { %v617_v47 = vmax.f32 %v523_v40, 0.0  ;;  %v633_v48 = vmax.f32 %v587_v41, 0.0  ;;  %1094 = vmatprep.mubr.msk.bf16.mxu0 (!%p944_p5), %vm1236_vm0, %v1235_v24  ;;  %1080 = vmatprep.subr.bf16.mxu0 (!%p944_p5), %v1235_v24  ;;  %v843_v37 = vand.u32 (!%p944_p5), 127, %v640_v25  ;;  %v844_v38 = vmul.u32 (!%p944_p5), 128, %v1340_v26 }
 0x121   : > { %v615_v51 = vmax.f32 %v515_v44, 0.0  ;;  %v631_v52 = vmax.f32 %v579_v45, 0.0  ;;  %v847_v40 = vstv (!%p944_p5), %s846_s24 }
 0x122   : > { %v1120_v53 = vpack.c.bf16 %v617_v47, %v616_v39  ;;  %v1118_v54 = vpack.c.bf16 %v633_v48, %v632_v46  ;;  %1113 = vmatpush3.bf16.msra.mxu1 %v1112_v21  ;;  %v845_v39 = vadd.s32 (!%p944_p5), %v844_v38, %v843_v37 }
 0x123   : > { %v1116_v55 = vpack.c.bf16 %v615_v51, %v614_v49  ;;  %v1114_v56 = vpack.c.bf16 %v631_v52, %v630_v50  ;;  %v1060_v57 = vpop.f32.mrb[12].mxu0  ;;  %v1076_v58 = vpop.f32.mrb[12].mxu1  ;;  %1081 = vmatpush3.bf16.msra.mxu0 (!%p944_p5), %v1189_v27  ;;  %v945_v52 = vld [vmem:[%s1450_s6] ss:$0 sm:$0xff] (!%p944_p5) }
 0x124   : > { %v536_v59 = vadd.f32 %v1060_v57, %v1352_v32  ;;  %v600_v60 = vadd.f32 %v1076_v58, %v1352_v32  ;;  %v527_v61 = vpop.f32.mrb[13].mxu0  ;;  %v591_v62 = vpop.f32.mrb[13].mxu1  ;;  %1082 = vmatprep.subr.bf16.mxu0 (!%p944_p5), %v1235_v24  ;;  %v848_v41 = vadd.s32 (!%p944_p5), %v847_v40, %v845_v39 }
 0x125   : > { %v528_v63 = vadd.f32 %v1352_v32, %v527_v61  ;;  %v592_v0 = vadd.f32 %v1352_v32, %v591_v62  ;;  %v1061_v1 = vpop.f32.mrb[14].mxu0  ;;  %v1077_v2 = vpop.f32.mrb[14].mxu1  ;;  %1115 = vmatprep.subr.bf16.mxu1 %v1114_v56 }
 0x126   : > { %v620_v3 = vmax.f32 %v536_v59, 0.0  ;;  %v539_v4 = vadd.f32 %v1061_v1, %v1352_v32  ;;  %v603_v5 = vadd.f32 %v1077_v2, %v1352_v32  ;;  %v530_v6 = vpop.f32.mrb[15].mxu0  ;;  %v594_v7 = vpop.f32.mrb[15].mxu1  ;;  %1117 = vmatpush3.bf16.msra.mxu1 %v1116_v55  ;;  %v636_v10 = vmax.f32 %v600_v60, 0.0 }
 0x127   : > { %v531_v8 = vadd.f32 %v1352_v32, %v530_v6  ;;  %v595_v9 = vadd.f32 %v1352_v32, %v594_v7  ;;  %1119 = vmatprep.subr.bf16.mxu1 %v1118_v54  ;;  %v618_v13 = vmax.f32 %v528_v63, 0.0  ;;  %v634_v14 = vmax.f32 %v592_v0, 0.0 }
 0x128   : > { %v621_v11 = vmax.f32 %v539_v4, 0.0  ;;  %v637_v12 = vmax.f32 %v603_v5, 0.0  ;;  %v849_v42 = vshra.s32 (!%p944_p5), %v848_v41, 16 }
 0x129   : > { %v619_v15 = vmax.f32 %v531_v8, 0.0  ;;  %v635_v16 = vmax.f32 %v595_v9, 0.0 }
 0x12a   : > { %v1128_v17 = vpack.c.bf16 %v621_v11, %v620_v3  ;;  %v1126_v18 = vpack.c.bf16 %v637_v12, %v636_v10  ;;  %1121 = vmatpush3.bf16.msra.mxu1 %v1120_v53  ;;  %v850_v43 = vxor.u32 (!%p944_p5), %v849_v42, %v848_v41 }
 0x12b   : > { %v1124_v19 = vpack.c.bf16 %v619_v15, %v618_v13  ;;  %v1122_v20 = vpack.c.bf16 %v635_v16, %v634_v14 }
 0x12c   : > { %v851_v44 = vmul.u32 (!%p944_p5), 668265263, %v850_v43 }
 0x12d   : > { %1123 = vmatprep.subr.bf16.mxu1 %v1122_v20 }
 0x12e   : > { %1125 = vmatpush3.bf16.msra.mxu1 %v1124_v19  ;;  %v852_v45 = vshra.s32 (!%p944_p5), %v851_v44, 15 }
 0x12f   : > { %1127 = vmatprep.subr.bf16.mxu1 %v1126_v18 }
 0x130   : > { %v853_v46 = vxor.u32 (!%p944_p5), %v852_v45, %v851_v44 }
 0x132   : > { %1129 = vmatpush3.bf16.msra.mxu1 %v1128_v17  ;;  %v854_v47 = vmul.u32 (!%p944_p5), 374761393, %v853_v46 }
 0x134   : > { %v855_v48 = vshra.s32 (!%p944_p5), %v854_v47, 16 }
 0x135   : > { %715 = vmatmul.mubr.f32.vlgmr.msra.gmra.mrb[16].mxu1 %v1347_v31  ;;  %v1190_v31 = vld [vmem:[%s1449_s5 + $0x10] sm:$0xff] (!%p944_p5)  }
 0x136   : > { %1083 = vmatpush3.bf16.msra.mxu0 (!%p944_p5), %v1190_v31  ;;  %v856_v49 = vxor.u32 (!%p944_p5), %v855_v48, %v854_v47 }
 0x137   : > { %1084 = vmatprep.subr.bf16.mxu0 (!%p944_p5), %v1235_v24 }
 0x138   : > { %v857_v50 = vand.u32 (!%p944_p5), 8388607, %v856_v49 }
 0x13a   : > { %1085 = vmatpush3.bf16.msra.mxu0 (!%p944_p5), %v1191_v28  ;;  %v858_v51 = vcvt.s32.f32 (!%p944_p5), %v857_v50 }
 0x13b   : > { %1086 = vmatprep.subr.bf16.mxu0 (!%p944_p5), %v1235_v24 }
 0x13c   : > { %v859_v53 = vmul.f32 (!%p944_p5), 1.1920929e-07, %v858_v51 }
 0x13e   : > { %1087 = vmatpush3.bf16.msra.mxu0 (!%p944_p5), %v1192_v29  ;;  %vm860_vm1 = vcmp.ge.f32.partialorder (!%p944_p5), %v859_v53, 0.5 }
 0x13f   : > { %1088 = vmatprep.subr.bf16.mxu0 (!%p944_p5), %v1235_v24 }
 0x142   : > { %1089 = vmatpush3.bf16.msra.mxu0 (!%p944_p5), %v1193_v30 }
 0x143   : > { %1090 = vmatprep.subr.bf16.mxu0 (!%p944_p5), %v1235_v24 }
 0x146   : > { %1091 = vmatpush3.bf16.msra.mxu0 (!%p944_p5), %v1194_v33 }
 0x147   : > { %1092 = vmatprep.subr.bf16.mxu0 (!%p944_p5), %v1235_v24 }
 0x14a   : > { %1093 = vmatpush3.bf16.msra.mxu0 (!%p944_p5), %v1195_v34 }
 0x206   : > { %725 = sbr.rel (%p944_p5) target bundleno = 754 (0x2f2), region = 52 }
 0x208   : > { %v1018_v32 = vpop.f32.mrb[16].mxu1 }
 0x209   : > { %v1019_v21 = vpop.f32.mrb[17].mxu1 }
 0x20a   : > { %v1020_v22 = vadd.f32 %v1019_v21, %v1018_v32 }
 0x20c   : > { %961 = vst [vmem:[%s959_s30 - $0x1] sm:$0x1] %v1020_v22 }
 0x213   : > { %v726_v35 = vld [vmem:[#allocation2] sm:$0xff] }
 0x214   : > { %v727_v36 = vpack.c.bf16 %v726_v35, %v726_v35 }
 0x216   : > { %1095 = vmatmul.mubr.bf16.vlgmr.msra.gmra.mrb[0].mxu0 %v727_v36 }
 0x2e9   : > { %v833_v25 = vpop.f32.mrb[0].mxu0 }
 0x2ea   : > { %v834_v26 = vadd.f32 %v945_v52, %v833_v25  ;;  %v1096_v54 = vpop.f32.mrb[1].mxu0 }
 0x2eb   : > { %v836_v55 = vpop.f32.mrb[2].mxu0 }
 0x2ec   : > { %v839_v56 = vmax.f32 %v834_v26, 0.0  ;;  %v1097_v57 = vpop.f32.mrb[3].mxu0 }
 0x2ee   : > { %v861_v58 = vmul.f32 2.0, %v839_v56 }
 0x2f0   : > { %v862_v59 = vsel %vm860_vm1, %v861_v58, 0.0 }
 0x2f1   : > { %863 = vst [vmem:[#allocation5] sm:$0x3] %v862_v59 }
 0x2f2 PF: > { %p1150_p6 = scmp.eq.s32.totalorder %s1287_s27, 1  ;;  %s1237_s28 = smov [#allocation5]  }
 0x2f3   : > { %s871_s29 = sshll.u32 %s1237_s28, 4  ;;  %s872_s29 = int_to_ptr.vmem [resolvable:$true] %s871_s29 }
 0x2f4   : > { %s1196_s30 = scalar_lea.vmem %s872_s29, 32  ;;  %p1203_p10 = scmp.lt.s32.totalorder %s872_s29, %s872_s29 }
 0x2f5   : > { %p1197_p7 = scmp.ne.s32.totalorder %s872_s29, %s1196_s30  ;;  %p1204_p11 = scmp.lt.s32.totalorder %s1196_s30, %s1196_s30 }
 0x2f7   : > { %p1198_p8 = pnand %p1197_p7, %p1150_p6  ;;  %p1205_p12 = por %p1204_p11, %p1203_p10 }
 0x2f9   : > { %p1199_p9 = pneg %p1198_p8 }
 0x2fb   : > { %p1206_p13 = pnand %p1205_p12, %p1199_p9 }
 0x2fd   : > { %1209 = shalt.err (!%p1206_p13)
}
 0x2fe   : > { %s1210_s10 = scalar_lea.hbm %s1451_s7, 32 }
 0x2ff   : > { %p1211_p0 = scmp.ne.s32.totalorder %s1451_s7, %s1210_s10  ;;  %p1216_p3 = scmp.lt.u32.totalorder %s1210_s10, %s1451_s7 }
 0x301   : > { %p1212_p1 = pnand %p1211_p0, %p1150_p6 }
 0x303   : > { %p1213_p2 = pneg %p1212_p1 }
 0x305   : > { %p1218_p4 = pnand %p1216_p3, %p1213_p2 }
 0x307   : > { %1221 = shalt.err (!%p1218_p4)
}
 0x308   : > { %1147 = dma.vmem_to_hbm [thread:$0]  (%p1150_p6), %s872_s29, 32, %s1451_s7, [#allocation6]  }
 0x309   : > { %1227 = dma.done.wait (%p1150_p6), [#allocation6], 32  }
 0x30a   : > { %1229 = vsyncadd (%p1150_p6), [#allocation6], 4294967264 }
 0x30b PF: > { %s19_s26 = sadd.s32 1, %s1232_s26  }
 0x30c   : > { %p16_p5 = scmp.ge.s32.totalorder %s19_s26, 4  }
 0x30e   :  { %18 = sbr.rel (!%p16_p5) target bundleno = 3 (0x3), region = 80 }
 0x315   :  { %884 = vsyncpa [#allocation6], 1 }
 0x316   :  { %886 = vsyncpa [#allocation6 + $0x1], 1 }

</bundles_post_ra>
